<compile_context>
chip_gen: v5e
topology: v5e:2x2
jax: 0.10.0
libtpu: 0.0.40
codegen_flags: <defaults>
</compile_context>

<pallas_src>
import jax
import jax.numpy as jnp
from jax.experimental import pallas as pl
from jax.experimental.pallas import tpu as pltpu


def _linear_kernel(x_ref, w_ref, b_ref, o_ref):
    # x_ref: (TB, D) VMEM tile, w_ref: (1, D) VMEM (resident across the grid),
    # b_ref: (1,) SMEM scalar, o_ref: (1, TB) VMEM (lane-dense output block).
    x = x_ref[...]
    w = w_ref[...]
    b = b_ref[0]
    # Contract D of both operands: (1, D) . (TB, D) -> (1, TB).  No transpose of
    # w is materialized and the batch axis ends up on the lane axis of the output.
    y = jax.lax.dot_general(
        w, x,
        dimension_numbers=(((1,), (1,)), ((), ())),
        preferred_element_type=jnp.float32,
    )
    o_ref[...] = (y + b).astype(o_ref.dtype)


def _round_up(n, m):
    return ((n + m - 1) // m) * m


def _choose_batch_tile(B, D):
    """Rows per grid step: one full block for small B, otherwise a multiple of
    128 sized so the x double buffer stays <= ~8 MiB (v7x-VMEM-safe)."""
    if B <= 256:
        return _round_up(B, 8)
    budget_bytes = 8 * 1024 * 1024
    max_rows = budget_bytes // (2 * D * 4)          # 2 buffers, f32
    tb = min(512, (max_rows // 128) * 128)
    return max(tb, 128)


@jax.jit
def logistic_reg_forward(x, weight, bias):
    """x: (B, D) f32, weight: (1, D) f32, bias: (1,) f32 -> (B, 1) logits."""
    B, D = x.shape
    assert weight.shape == (1, D)

    tb = _choose_batch_tile(B, D)
    bp = _round_up(B, tb)
    if bp != B:
        x = jnp.pad(x, ((0, bp - B), (0, 0)))       # zero rows, sliced off below

    grid = (pl.cdiv(bp, tb),)

    out = pl.pallas_call(
        _linear_kernel,
        out_shape=jax.ShapeDtypeStruct((1, bp), x.dtype),
        grid=grid,
        in_specs=[
            pl.BlockSpec((tb, D), lambda i: (i, 0)),            # x: streamed row tiles
            pl.BlockSpec((1, D), lambda i: (0, 0)),             # weight: resident
            pl.BlockSpec(memory_space=pltpu.MemorySpace.SMEM),  # bias: SMEM scalar
        ],
        out_specs=pl.BlockSpec((1, tb), lambda i: (0, i)),      # lane-dense output
        compiler_params=pltpu.CompilerParams(
            dimension_semantics=("parallel",),                  # shard tiles across TCs
        ),
    )(x, weight, bias.reshape(-1))

    # (1, Bp) lane-dense result -> (B, 1) to match nn.Linear(input_size, 1).
    return out[0, :B].reshape(B, 1)


if __name__ == "__main__":
    key = jax.random.PRNGKey(0)
    k_x, k_w, k_b = jax.random.split(key, 3)

    B, D = 8, 32  # batch, input_size

    x = jax.random.normal(k_x, (B, D), dtype=jnp.float32)

    # Deterministic init mimicking nn.Linear defaults: U(-1/sqrt(D), 1/sqrt(D)).
    bound = 1.0 / float(D) ** 0.5
    weight = jax.random.uniform(k_w, (1, D), dtype=jnp.float32,
                                minval=-bound, maxval=bound)
    bias = jax.random.uniform(k_b, (1,), dtype=jnp.float32,
                              minval=-bound, maxval=bound)

    out = jax.block_until_ready(logistic_reg_forward(x, weight, bias))

    # Sanity check against plain-JAX reference.
    ref = x @ weight.T + bias.reshape(1, 1)
    assert out.shape == (B, 1)
    assert jnp.allclose(out, ref, atol=1e-5, rtol=1e-5)

    print("KERNEL_OK")
</pallas_src>

<mosaic_0001>
module attributes {stable_mosaic.version = 11 : i64} {
  func.func @_linear_kernel(%arg0: i32, %arg1: memref<8x32xf32, #tpu.memory_space<vmem>>, %arg2: memref<1x32xf32, #tpu.memory_space<vmem>>, %arg3: memref<1xf32, #tpu.memory_space<smem>>, %arg4: memref<1x8xf32, #tpu.memory_space<vmem>>) attributes {dimension_semantics = [#tpu.dimension_semantics<parallel>], iteration_bounds = array<i64: 1>, scalar_prefetch = 0 : i64, scratch_operands = 0 : i64, tpu.core_type = #tpu.core_type<tc>, window_params = [{transform_indices = @transform_0, window_bounds = array<i64: 8, 32>}, {pipeline_mode = #tpu.pipeline_mode<synchronous>, transform_indices = @transform_1, window_bounds = array<i64: 1, 32>}, {transform_indices = @transform_2, window_bounds = array<i64: 1>}, {transform_indices = @transform_3, window_bounds = array<i64: 1, 8>}]} {
    %c0 = arith.constant 0 : index
    %c0_0 = arith.constant 0 : index
    %0 = vector.load %arg1[%c0, %c0_0] : memref<8x32xf32, #tpu.memory_space<vmem>>, vector<8x32xf32>
    %c0_1 = arith.constant 0 : index
    %c0_2 = arith.constant 0 : index
    %1 = vector.load %arg2[%c0_1, %c0_2] : memref<1x32xf32, #tpu.memory_space<vmem>>, vector<1x32xf32>
    %c0_3 = arith.constant 0 : index
    %2 = memref.load %arg3[%c0_3] : memref<1xf32, #tpu.memory_space<smem>>
    %cst = arith.constant dense<0.000000e+00> : vector<1x8xf32>
    %3 = tpu.matmul %1, %0, %cst {dimension_numbers = #tpu.dot_dimension_numbers<[1], [1], [0], [0], [0, 0, 1, 0], [], []>} : vector<1x32xf32>, vector<8x32xf32>, vector<1x8xf32> -> vector<1x8xf32>
    %4 = vector.broadcast %2 : f32 to vector<1x8xf32>
    %5 = arith.addf %3, %4 : vector<1x8xf32>
    %c0_4 = arith.constant 0 : index
    %c0_5 = arith.constant 0 : index
    %6 = vector.load %arg4[%c0_4, %c0_5] : memref<1x8xf32, #tpu.memory_space<vmem>>, vector<1x8xf32>
    tpu.vector_store %arg4[%c0_4, %c0_5], %5 {strides = array<i32>} : memref<1x8xf32, #tpu.memory_space<vmem>>, vector<1x8xf32>,
    return
  }
  func.func @transform_0(%arg0: i32) -> (i32, i32) {
    %c0_i32 = arith.constant 0 : i32
    %c0_i32_0 = arith.constant 0 : i32
    return %arg0, %c0_i32 : i32, i32
  }
  func.func @transform_1(%arg0: i32) -> (i32, i32) {
    %c0_i32 = arith.constant 0 : i32
    %c0_i32_0 = arith.constant 0 : i32
    %c0_i32_1 = arith.constant 0 : i32
    return %c0_i32, %c0_i32_0 : i32, i32
  }
  func.func @transform_2(%arg0: i32) -> i32 {
    %c0_i32 = arith.constant 0 : i32
    %c0_i32_0 = arith.constant 0 : i32
    return %c0_i32 : i32
  }
  func.func @transform_3(%arg0: i32) -> (i32, i32) {
    %c0_i32 = arith.constant 0 : i32
    %c0_i32_0 = arith.constant 0 : i32
    return %c0_i32, %arg0 : i32, i32
  }
}

</mosaic_0001>

<bundles_post_ra>
// kernel: logistic_reg_forward.1
= control target key start
LH: loop header
LB: loop body
LE: loop exit
PB: predicated region body
PF: predicated region fallthrough
CT: control target
= control target key end

     0   :  { %9 = vsyncpa [#allocation4], 0  ;;  %s170_s0 = inlined_call_operand.hbm [shape: f32[8,32], index: 0, kind: input, shape index: {}]   ;;  %s171_s1 = inlined_call_operand.vmem [shape: f32[1,32], index: 1, kind: input, shape index: {}]   ;;  %s172_s2 = inlined_call_operand.<no memory space> [shape: f32[1], index: 2, kind: input, shape index: {}]   ;;  %s173_s3 = inlined_call_operand.hbm [shape: f32[1,8], index: 3, kind: output, shape index: {}]  }
   0x1   :  { %10 = vsyncpa [#allocation5], 0  ;;  %s16_s14 = sshll.u32 %s170_s0, 4  ;;  %s136_s15 = smov [#allocation3]   ;;  %s17_s14 = int_to_ptr.hbm [resolvable:$true] %s16_s14 }
   0x2   :  { %s18_s16 = sshll.u32 %s136_s15, 4  ;;  %s19_s16 = int_to_ptr.vmem [resolvable:$true] %s18_s16 }
   0x3   :  { %21 = dma.hbm_to_vmem [thread:$0]  %s17_s14, 128, %s19_s16, [#allocation4]  }
   0x4   :  { %132 = dma.done.wait [#allocation4], 128  }
   0x5   :  { %133 = vsyncadd [#allocation4], 4294967168  ;;  %vm34_vm0 = vcmask 261120   ;;  %v30_v0 = vld [vmem:[#allocation3] sm:$0xff]  ;;  %v33_v2 = vstv %s172_s2  ;;  %s137_s0 = smov [#allocation6]   ;;  %s70_s24 = sshll.u32 %s173_s3, 4  ;;  %s71_s24 = int_to_ptr.hbm [resolvable:$true] %s70_s24 }
   0x6   :  { %80 = vmatpush.xpose.msk.msra.mxu0 %vm34_vm0, %v30_v0  ;;  %v31_v1 = vld [vmem:[%s171_s1] sm:$0x1]  ;;  %s68_s21 = sshll.u32 %s137_s0, 4  ;;  %vm61_vm1 = vcmask 57344   ;;  %s69_s21 = int_to_ptr.vmem [resolvable:$true] %s68_s21 }
   0x9   :  { %81 = vmatmul.msk.f32.vlgmr.msra.gmra.mxu0 %vm34_vm0, %v31_v1 }
  0x86   :  { %v58_v3 = vpop.f32.mrf.mxu0 }
  0x87   :  { %v59_v4 = vadd.f32 %v58_v3, %v33_v2 }
  0x89   :  { %62 = vst.msk [vmem:[#allocation6] sm:$0x1] %vm61_vm1, %v59_v4 }
  0x8a   :  { %73 = dma.vmem_to_hbm [thread:$0]  %s69_s21, 16, %s71_s24, [#allocation5]  }
  0x8b   :  { %134 = dma.done.wait [#allocation5], 16  }
  0x8c   :  { %135 = vsyncadd [#allocation5], 4294967280 }
  0x8d   :  { %78 = vsyncpa [#allocation4], 1 }
  0x8e   :  { %79 = vsyncpa [#allocation5], 1 }

</bundles_post_ra>
